<compile_context>
chip_gen: v7x
topology: tpu7x:2x2x1
jax: 0.10.0
libtpu: 0.0.40
codegen_flags: <defaults>
</compile_context>

<pallas_src>
import functools

import jax
import jax.numpy as jnp
from jax.experimental import pallas as pl
from jax.experimental.pallas import tpu as pltpu


_MASK_VALUE = -1e30  # finite "minus infinity" for padded batch rows


def _round_up(x, n):
    return ((x + n - 1) // n) * n


def _pick_chunk(tile_b):
    """Largest sublane chunk (<= 256 rows) that divides the batch tile."""
    if tile_b <= 256:
        return tile_b
    for c in (256, 128, 64, 32, 16, 8):
        if tile_b % c == 0:
            return c
    return tile_b


def _vmem_limit_bytes(tile_b, tile_m, d, mean_rows, chunk, mm_bytes):
    """Rough VMEM footprint (double-buffered inputs + live temporaries)."""
    lane = lambda n: _round_up(max(n, 1), 128)
    sub = lambda n: _round_up(max(n, 1), 8)
    est = 0
    est += 2 * sub(mean_rows) * lane(d) * mm_bytes     # mean (resident or tile)
    est += 2 * sub(d) * lane(tile_m) * mm_bytes        # e^T tile
    est += 2 * sub(tile_b) * lane(1) * 4               # m_sq tile
    est += 2 * sub(1) * lane(tile_m) * 4               # output tile
    est += 2 * sub(1) * lane(tile_m) * 4               # scratch (m, l)
    est += 2 * sub(chunk) * lane(tile_m) * 4           # in-flight (chunk, tM) f32
    est = int(est * 1.5) + (2 << 20)
    # >= 32 MiB (beats the 16/32 MiB scoped defaults), <= 64 MiB (v7x physical).
    return max(32 << 20, min(64 << 20, est))


def _make_lse_kernel(n_b_tiles, tile_b, chunk_rows, mean_resident):
    """Online-LSE kernel. coef is pre-folded into the inputs (see wrapper)."""
    n_chunks = tile_b // chunk_rows

    def kernel(msq_ref, mean_ref, e_ref, lse_ref, m_sc, l_sc):
        b = pl.program_id(1)

        @pl.when(b == 0)
        def _init():
            m_sc[...] = jnp.full_like(m_sc, -jnp.inf)
            l_sc[...] = jnp.zeros_like(l_sc)

        e_t = e_ref[...]                                   # (D, tM), matmul dtype
        base = b * tile_b if mean_resident else 0          # row offset into mean ref

        def chunk_body(c, carry):
            m_run, l_run = carry
            r_loc = pl.multiple_of(c * chunk_rows, chunk_rows)
            r_mean = pl.multiple_of(base + c * chunk_rows, chunk_rows)
            lhs = mean_ref[pl.ds(r_mean, chunk_rows), :]   # pre-scaled by -2*coef
            msq = msq_ref[pl.ds(r_loc, chunk_rows), :]     # (chunk, 1) f32, mask baked in
            # (chunk, tM) = (-2*coef * mean) @ e^T  (MXU, f32 accumulate)
            s = jax.lax.dot_general(
                lhs, e_t,
                dimension_numbers=(((1,), (0,)), ((), ())),
                preferred_element_type=jnp.float32) + msq
            # fused online logsumexp update over the batch (sublane) axis
            m_new = jnp.maximum(m_run, jnp.max(s, axis=0, keepdims=True))
            l_new = (l_run * jnp.exp(m_run - m_new)
                     + jnp.sum(jnp.exp(s - m_new), axis=0, keepdims=True))
            return m_new, l_new

        m_fin, l_fin = jax.lax.fori_loop(
            0, n_chunks, chunk_body, (m_sc[...], l_sc[...]), unroll=True)
        m_sc[...] = m_fin
        l_sc[...] = l_fin

        @pl.when(b == n_b_tiles - 1)
        def _finalize():
            lse_ref[...] = m_sc[...] + jnp.log(l_sc[...])

    return kernel


@functools.partial(jax.jit,
                   static_argnames=("sigma", "block_b", "block_m", "matmul_dtype"))
def lse_latent_loss(mean, e, sigma, *, block_b=512, block_m=2048,
                    matmul_dtype=jnp.bfloat16):
    """mean: (B, z_dim), e: (M, z_dim), sigma: python float -> scalar f32 loss."""
    B, D = mean.shape
    M, D2 = e.shape
    assert D == D2, (mean.shape, e.shape)

    coef = -1.0 / (2.0 * float(sigma) ** 2)
    neg_two_coef = -2.0 * coef
    mm_dtype = jnp.dtype(matmul_dtype)

    mean_f32 = mean.astype(jnp.float32)
    e_f32 = e.astype(jnp.float32)

    # Hoisted ||e||^2 term: one scalar (exact, computed on the unpadded f32 e).
    e_sq_mean = jnp.mean(jnp.sum(e_f32 * e_f32, axis=1))

    # --- tiling -------------------------------------------------------------
    tB = min(block_b, _round_up(B, 8))
    B_pad = _round_up(B, tB)
    M_pad128 = _round_up(M, 128)
    tM = min(block_m, M_pad128)
    # v7x: keep n_m >= 2 so the "parallel" m axis can feed both TensorCores.
    if M_pad128 >= 256:
        tM = min(tM, _round_up(M_pad128 // 2, 128))
    M_pad = _round_up(M, tM)
    n_b = B_pad // tB
    n_m = M_pad // tM
    chunk = _pick_chunk(tB)

    # --- host-side precompute (done once, not once per M tile) ---------------
    # LHS with -2*coef folded in, cast to the MXU dtype.
    mean_scaled = (mean_f32 * neg_two_coef).astype(mm_dtype)         # (B, D)
    if B_pad != B:
        mean_scaled = jnp.pad(mean_scaled, ((0, B_pad - B), (0, 0)))
    # coef*||mean||^2 column + padding mask (padded rows -> exp ~ 0).
    m_sq = coef * jnp.sum(mean_f32 * mean_f32, axis=1, keepdims=True)  # (B, 1)
    if B_pad != B:
        m_sq = jnp.pad(m_sq, ((0, B_pad - B), (0, 0)),
                       constant_values=_MASK_VALUE)
    # MXU-native (K, N) RHS, lane-dense along M.  (In production, generate e
    # directly in (D, M) layout; here we keep torch's (M, D) API and transpose.)
    e_t = e.astype(mm_dtype).T                                        # (D, M)
    if M_pad != M:
        e_t = jnp.pad(e_t, ((0, 0), (0, M_pad - M)))

    # If the whole (pre-scaled) mean fits comfortably in VMEM, keep it resident
    # (DMA'd once) instead of re-reading a tile for every M tile.
    mean_resident = (B_pad * D * mm_dtype.itemsize) <= (4 << 20)
    if mean_resident:
        mean_spec = pl.BlockSpec((B_pad, D), lambda m, b: (0, 0))
        mean_rows = B_pad
    else:
        mean_spec = pl.BlockSpec((tB, D), lambda m, b: (b, 0))
        mean_rows = tB

    kernel = _make_lse_kernel(n_b, tB, chunk, mean_resident)

    vmem_limit = _vmem_limit_bytes(tB, tM, D, mean_rows, chunk, mm_dtype.itemsize)
    cost = pl.CostEstimate(
        flops=2 * B_pad * M_pad * D,
        transcendentals=B_pad * M_pad,
        bytes_accessed=(B_pad * D + M_pad * D) * mm_dtype.itemsize
                       + B_pad * 4 + M_pad * 4,
    )

    lse = pl.pallas_call(
        kernel,
        out_shape=jax.ShapeDtypeStruct((1, M_pad), jnp.float32),
        grid_spec=pltpu.PrefetchScalarGridSpec(
            num_scalar_prefetch=0,
            grid=(n_m, n_b),                                  # b (reduction) innermost
            in_specs=[
                pl.BlockSpec((tB, 1), lambda m, b: (b, 0)),   # m_sq (+ mask)
                mean_spec,                                    # pre-scaled mean
                pl.BlockSpec((D, tM), lambda m, b: (0, m)),   # e^T tile
            ],
            out_specs=pl.BlockSpec((1, tM), lambda m, b: (0, m)),
            scratch_shapes=[pltpu.VMEM((1, tM), jnp.float32),   # running max
                            pltpu.VMEM((1, tM), jnp.float32)],  # running sum-exp
        ),
        compiler_params=pltpu.CompilerParams(
            dimension_semantics=("parallel", "arbitrary"),
            vmem_limit_bytes=vmem_limit,
        ),
        cost_estimate=cost,
    )(m_sq, mean_scaled, e_t)

    # loss = -mean_m( coef*||e_m||^2 + lse_m ) over the real M columns only.
    return -(jnp.mean(lse[0, :M]) + coef * e_sq_mean)


def latent_layer_forward(data, *, M, sigma, rng_key, matmul_dtype=jnp.bfloat16):
    """Mirrors LatentLayer.forward: adds 'lse_loss' to the data dict."""
    mean = data['z']                         # (B, z_dim)
    z_dim = mean.shape[1]
    # torch.randn(M, z_dim) equivalent, deterministic via rng_key.
    e = jax.random.normal(rng_key, (M, z_dim), dtype=jnp.float32)
    data = dict(data)
    data['lse_loss'] = lse_latent_loss(mean, e, sigma=sigma,
                                       matmul_dtype=matmul_dtype)
    return data


def _reference_loss(mean, e, sigma):
    diff = mean[:, None, :] - e[None, :, :]
    dist = jnp.sum(diff * diff, axis=2)                       # (B, M)
    scaled = (-1.0 / (2.0 * sigma ** 2)) * dist
    return -jnp.mean(jax.scipy.special.logsumexp(scaled, axis=0))


if __name__ == "__main__":
    key = jax.random.PRNGKey(0)
    k_z, k_e = jax.random.split(key)

    B, z_dim, M = 8, 32, 16
    sigma = 1.5

    z = jax.random.normal(k_z, (B, z_dim), dtype=jnp.float32)
    e = jax.random.normal(k_e, (M, z_dim), dtype=jnp.float32)
    ref = _reference_loss(z, e, sigma)

    # Exact path (f32 MXU operands) — tight tolerance vs the pure-JAX reference.
    loss_f32 = jax.block_until_ready(
        lse_latent_loss(z, e, sigma, matmul_dtype=jnp.float32))
    assert jnp.allclose(loss_f32, ref, rtol=1e-5, atol=1e-5), (loss_f32, ref)

    # Default fast path (bf16 MXU operands) through the module-style wrapper.
    data = latent_layer_forward({'z': z}, M=M, sigma=sigma, rng_key=k_e)
    loss_bf16 = jax.block_until_ready(data['lse_loss'])
    assert jnp.allclose(loss_bf16, ref, rtol=3e-2, atol=3e-2), (loss_bf16, ref)

    print("KERNEL_OK")
</pallas_src>

<mosaic_0001>
module attributes {stable_mosaic.version = 11 : i64} {
  func.func @kernel(%arg0: i32, %arg1: i32, %arg2: memref<8x1xf32, #tpu.memory_space<vmem>>, %arg3: memref<8x32xf32, #tpu.memory_space<vmem>>, %arg4: memref<32x128xf32, #tpu.memory_space<vmem>>, %arg5: memref<1x128xf32, #tpu.memory_space<vmem>>, %arg6: memref<1x128xf32, #tpu.memory_space<vmem>>, %arg7: memref<1x128xf32, #tpu.memory_space<vmem>>) attributes {dimension_semantics = [#tpu.dimension_semantics<parallel>, #tpu.dimension_semantics<arbitrary>], iteration_bounds = array<i64: 1, 1>, scalar_prefetch = 0 : i64, scratch_operands = 2 : i64, tpu.core_type = #tpu.core_type<tc>, window_params = [{transform_indices = @transform_0, window_bounds = array<i64: 8, 1>}, {pipeline_mode = #tpu.pipeline_mode<synchronous>, transform_indices = @transform_1, window_bounds = array<i64: 8, 32>}, {transform_indices = @transform_2, window_bounds = array<i64: 32, 128>}, {transform_indices = @transform_3, window_bounds = array<i64: 1, 128>}]} {
    %c0_i32 = arith.constant 0 : i32
    %0 = arith.cmpi eq, %arg1, %c0_i32 : i32
    %1 = arith.extui %0 : i1 to i32
    %c0_i32_0 = arith.constant 0 : i32
    %2 = arith.cmpi ne, %1, %c0_i32_0 : i32
    scf.if %2 {
      %cst_19 = arith.constant 0xFF800000 : f32
      %36 = vector.broadcast %cst_19 : f32 to vector<1x128xf32>
      %c0_20 = arith.constant 0 : index
      %c0_21 = arith.constant 0 : index
      %37 = vector.load %arg6[%c0_20, %c0_21] : memref<1x128xf32, #tpu.memory_space<vmem>>, vector<1x128xf32>
      tpu.vector_store %arg6[%c0_20, %c0_21], %36 {strides = array<i32>} : memref<1x128xf32, #tpu.memory_space<vmem>>, vector<1x128xf32>,
      %cst_22 = arith.constant 0.000000e+00 : f32
      %38 = vector.broadcast %cst_22 : f32 to vector<1x128xf32>
      %c0_23 = arith.constant 0 : index
      %c0_24 = arith.constant 0 : index
      %39 = vector.load %arg7[%c0_23, %c0_24] : memref<1x128xf32, #tpu.memory_space<vmem>>, vector<1x128xf32>
      tpu.vector_store %arg7[%c0_23, %c0_24], %38 {strides = array<i32>} : memref<1x128xf32, #tpu.memory_space<vmem>>, vector<1x128xf32>,
    } else {
    }
    %c0 = arith.constant 0 : index
    %c0_1 = arith.constant 0 : index
    %3 = vector.load %arg4[%c0, %c0_1] : memref<32x128xf32, #tpu.memory_space<vmem>>, vector<32x128xf32>
    %c8_i32 = arith.constant 8 : i32
    %4 = arith.muli %arg1, %c8_i32 : i32
    %c0_2 = arith.constant 0 : index
    %c0_3 = arith.constant 0 : index
    %5 = vector.load %arg6[%c0_2, %c0_3] : memref<1x128xf32, #tpu.memory_space<vmem>>, vector<1x128xf32>
    %c0_4 = arith.constant 0 : index
    %c0_5 = arith.constant 0 : index
    %6 = vector.load %arg7[%c0_4, %c0_5] : memref<1x128xf32, #tpu.memory_space<vmem>>, vector<1x128xf32>
    %c0_i32_6 = arith.constant 0 : i32
    %c8_i32_7 = arith.constant 8 : i32
    %7 = arith.muli %c0_i32_6, %c8_i32_7 : i32
    %8 = tpu.assume_multiple %7, 8 : i32
    %c8_i32_8 = arith.constant 8 : i32
    %9 = arith.muli %c0_i32_6, %c8_i32_8 : i32
    %10 = arith.addi %4, %9 : i32
    %11 = tpu.assume_multiple %10, 8 : i32
    %12 = arith.index_cast %11 : i32 to index
    %c0_9 = arith.constant 0 : index
    %13 = vector.load %arg3[%12, %c0_9] : memref<8x32xf32, #tpu.memory_space<vmem>>, vector<8x32xf32>
    %14 = arith.index_cast %8 : i32 to index
    %c0_10 = arith.constant 0 : index
    %15 = vector.load %arg2[%14, %c0_10] : memref<8x1xf32, #tpu.memory_space<vmem>>, vector<8x1xf32>
    %cst = arith.constant dense<0.000000e+00> : vector<8x128xf32>
    %16 = tpu.matmul %13, %3, %cst {dimension_numbers = #tpu.dot_dimension_numbers<[1], [0], [0], [1], [0, 0, 1, 1], [], []>} : vector<8x32xf32>, vector<32x128xf32>, vector<8x128xf32> -> vector<8x128xf32>
    %17 = vector.broadcast %15 : vector<8x1xf32> to vector<8x128xf32>
    %18 = arith.addf %16, %17 : vector<8x128xf32>
    %cst_11 = arith.constant dense<0xFF800000> : vector<128xf32>
    %19 = vector.multi_reduction <maximumf>, %18, %cst_11 [0] : vector<8x128xf32> to vector<128xf32>
    %20 = vector.shape_cast %19 : vector<128xf32> to vector<1x128xf32>
    %21 = arith.maximumf %5, %20 : vector<1x128xf32>
    %22 = arith.subf %5, %21 : vector<1x128xf32>
    %23 = math.exp %22 : vector<1x128xf32>
    %24 = arith.mulf %6, %23 : vector<1x128xf32>
    %25 = vector.broadcast %21 : vector<1x128xf32> to vector<8x128xf32>
    %26 = arith.subf %18, %25 : vector<8x128xf32>
    %27 = math.exp %26 : vector<8x128xf32>
    %cst_12 = arith.constant dense<0.000000e+00> : vector<128xf32>
    %28 = vector.multi_reduction <add>, %27, %cst_12 [0] : vector<8x128xf32> to vector<128xf32>
    %29 = vector.shape_cast %28 : vector<128xf32> to vector<1x128xf32>
    %30 = arith.addf %24, %29 : vector<1x128xf32>
    %c1_i32 = arith.constant 1 : i32
    %c0_13 = arith.constant 0 : index
    %c0_14 = arith.constant 0 : index
    %31 = vector.load %arg6[%c0_13, %c0_14] : memref<1x128xf32, #tpu.memory_space<vmem>>, vector<1x128xf32>
    tpu.vector_store %arg6[%c0_13, %c0_14], %21 {strides = array<i32>} : memref<1x128xf32, #tpu.memory_space<vmem>>, vector<1x128xf32>,
    %c0_15 = arith.constant 0 : index
    %c0_16 = arith.constant 0 : index
    %32 = vector.load %arg7[%c0_15, %c0_16] : memref<1x128xf32, #tpu.memory_space<vmem>>, vector<1x128xf32>
    tpu.vector_store %arg7[%c0_15, %c0_16], %30 {strides = array<i32>} : memref<1x128xf32, #tpu.memory_space<vmem>>, vector<1x128xf32>,
    %c0_i32_17 = arith.constant 0 : i32
    %33 = arith.cmpi eq, %arg1, %c0_i32_17 : i32
    %34 = arith.extui %33 : i1 to i32
    %c0_i32_18 = arith.constant 0 : i32
    %35 = arith.cmpi ne, %34, %c0_i32_18 : i32
    scf.if %35 {
      %c0_19 = arith.constant 0 : index
      %c0_20 = arith.constant 0 : index
      %36 = vector.load %arg6[%c0_19, %c0_20] : memref<1x128xf32, #tpu.memory_space<vmem>>, vector<1x128xf32>
      %c0_21 = arith.constant 0 : index
      %c0_22 = arith.constant 0 : index
      %37 = vector.load %arg7[%c0_21, %c0_22] : memref<1x128xf32, #tpu.memory_space<vmem>>, vector<1x128xf32>
      %38 = math.log %37 : vector<1x128xf32>
      %39 = arith.addf %36, %38 : vector<1x128xf32>
      %c0_23 = arith.constant 0 : index
      %c0_24 = arith.constant 0 : index
      %40 = vector.load %arg5[%c0_23, %c0_24] : memref<1x128xf32, #tpu.memory_space<vmem>>, vector<1x128xf32>
      tpu.vector_store %arg5[%c0_23, %c0_24], %39 {strides = array<i32>} : memref<1x128xf32, #tpu.memory_space<vmem>>, vector<1x128xf32>,
    } else {
    }
    return
  }
  func.func @transform_0(%arg0: i32, %arg1: i32) -> (i32, i32) {
    %c0_i32 = arith.constant 0 : i32
    %c0_i32_0 = arith.constant 0 : i32
    return %arg1, %c0_i32 : i32, i32
  }
  func.func @transform_1(%arg0: i32, %arg1: i32) -> (i32, i32) {
    %c0_i32 = arith.constant 0 : i32
    %c0_i32_0 = arith.constant 0 : i32
    %c0_i32_1 = arith.constant 0 : i32
    return %c0_i32, %c0_i32_0 : i32, i32
  }
  func.func @transform_2(%arg0: i32, %arg1: i32) -> (i32, i32) {
    %c0_i32 = arith.constant 0 : i32
    %c0_i32_0 = arith.constant 0 : i32
    return %c0_i32, %arg0 : i32, i32
  }
  func.func @transform_3(%arg0: i32, %arg1: i32) -> (i32, i32) {
    %c0_i32 = arith.constant 0 : i32
    %c0_i32_0 = arith.constant 0 : i32
    return %c0_i32, %arg0 : i32, i32
  }
}

</mosaic_0001>

<bundles_post_ra>
// kernel: lse_latent_loss.1
= control target key start
LH: loop header
LB: loop body
LE: loop exit
PB: predicated region body
PF: predicated region fallthrough
CT: control target
= control target key end

     0   :  { %v186_v0 = vmov 0.0|0.0   ;;  %v187_v4 = vmov 0.0   ;;  %vm188_vm0 = vmmov 0   ;;  %v189_v7 = vmov 0   ;;  %s232_s2 = inlined_call_operand.vmem [shape: f32[32,128], index: 2, kind: input, shape index: {}]   ;;  %s233_s0 = inlined_call_operand.vmem [shape: f32[8,1], index: 0, kind: input, shape index: {}]   ;;  %s234_s1 = inlined_call_operand.vmem [shape: f32[8,32], index: 1, kind: input, shape index: {}]   ;;  %s235_s3 = inlined_call_operand.vmem [shape: f32[1,128], index: 3, kind: output, shape index: {}]  }
   0x1   :  { %168 = vmatprep.subr.bf16.mxu0 %v186_v0  ;;  %v20_v1 = vld [vmem:[%s232_s2] sm:$0xff]  ;;  %v21_v2 = vld [vmem:[%s232_s2 + $0x8] sm:$0xff]  ;;  %v22_v3 = vld [vmem:[%s232_s2 + $0x10] sm:$0xff]  ;;  %19 = vst [vmem:[#allocation3] sm:$0x1] %v187_v4  ;;  %165 = vmatprep.mubr.msk.f32.mxu0 %vm188_vm0, %v187_v4  ;;  %vm35_vm1 = vcmask 261120   ;;  %v121_v17 = vlaneseq }
   0x2   :  { %v169_v5 = vpack.c.bf16 %v21_v2, %v20_v1  ;;  %v23_v6 = vld [vmem:[%s232_s2 + $0x18] sm:$0xff]  ;;  %179 = vset.pattern.permute.xlu0 %v189_v7  ;;  %v29_v8 = vld [vmem:[%s233_s0] sm:$0xff]  ;;  %v190_v11 = vmov -inf  }
   0x3   :  { %32 = vperm.xlu0 %179, %v29_v8   ;;  %v172_v9 = vpack.c.bf16 %v23_v6, %v22_v3  ;;  %v28_v10 = vld [vmem:[%s234_s1] sm:$0xff]  ;;  %18 = vst [vmem:[#allocation2] sm:$0x1] %v190_v11  ;;  %v122_v20 = vshrl.u32 %v121_v17, 7 }
   0x4   :  { %170 = vmatpush3.bf16.msra.mxu0 %v169_v5 }
   0x5   :  { %171 = vmatprep.subr.bf16.mxu0 %v186_v0  ;;  %v123_v24 = vsub.s32 0, %v122_v20 }
   0x8   :  { %173 = vmatpush3.bf16.msra.mxu0 %v172_v9  ;;  %v26_v38 = vld [vmem:[#allocation3] sm:$0x1] }
   0xa   :  { %v25_v23 = vld [vmem:[#allocation2] sm:$0x1] }
   0xb   :  { %166 = vmatmul.mubr.msk.f32.vlgmr.msra.gmra.mrb[0].mxu0 %vm35_vm1, %v28_v10 }
  0x82   :  { %v33_v12 = vpop.permute.xlu0 %32 }
  0xde   :  { %v105_v13 = vpop.f32.mrb[0].mxu0 }
  0xdf   :  { %v106_v14 = vadd.f32 %v105_v13, %v33_v12  ;;  %v167_v15 = vpop.f32.mrb[1].mxu0 }
  0xe1   :  { %v109_v16 = vrot.slane %v106_v14, 4 }
  0xe3   :  { %v110_v18 = vmax.f32 %v106_v14, %v109_v16 }
  0xe5   :  { %v111_v19 = vrot.slane %v110_v18, 2 }
  0xe7   :  { %v112_v21 = vmax.f32 %v110_v18, %v111_v19 }
  0xe9   :  { %v113_v22 = vrot.slane %v112_v21, 1 }
  0xeb   :  { %v114_v25 = vmax.f32 %v112_v21, %v113_v22 }
  0xed   :  { %v115_v26 = vmax.f32 %v25_v23, %v114_v25 }
  0xef   :  { %v124_v27 = vrot.slane %v115_v26, %v123_v24  ;;  %136 = vst [vmem:[#allocation2] sm:$0x1] %v115_v26  ;;  %v116_v30 = vsub.f32 %v25_v23, %v115_v26 }
  0xf1   :  { %v126_v28 = vsub.f32 %v106_v14, %v124_v27  ;;  %v117_v31 = vmul.f32 1.442695, %v116_v30 }
  0xf3   :  { %v127_v29 = vmul.f32 1.442695, %v126_v28 }
  0xf5   :  { %180 = vpow2.f32 %v127_v29 }
  0xf6   :  { %182 = vpow2.f32 %v117_v31  ;;  %v141_v46 = vld [vmem:[#allocation2] sm:$0x1] }
  0xff   :  { %v181_v32 = vpop.eup %180 }
 0x100   :  { %v129_v33 = vrot.slane %v181_v32, 4  ;;  %v183_v37 = vpop.eup %182 }
 0x101   :  { %v119_v40 = vmul.f32 %v183_v37, %v26_v38 }
 0x102   :  { %v130_v34 = vadd.f32 %v181_v32, %v129_v33 }
 0x104   :  { %v131_v35 = vrot.slane %v130_v34, 2 }
 0x106   :  { %v132_v36 = vadd.f32 %v131_v35, %v130_v34 }
 0x108   :  { %v133_v39 = vrot.slane %v132_v36, 1 }
 0x10a   :  { %v134_v41 = vadd.f32 %v133_v39, %v132_v36 }
 0x10c   :  { %v135_v42 = vadd.f32 %v134_v41, %v119_v40 }
 0x10e   :  { %137 = vst [vmem:[#allocation3] sm:$0x1] %v135_v42 }
 0x115   :  { %v142_v43 = vld [vmem:[#allocation3] sm:$0x1] }
 0x116   :  { %184 = vlog2.f32 %v142_v43 }
 0x120   :  { %v185_v44 = vpop.eup %184 }
 0x121   :  { %v144_v45 = vmul.f32 0.6931472, %v185_v44 }
 0x123   :  { %v145_v47 = vadd.f32 %v144_v45, %v141_v46 }
 0x125   :  { %146 = vst [vmem:[%s235_s3] sm:$0x1] %v145_v47 }

</bundles_post_ra>
